<compile_context>
chip_gen: v6e
topology: v6e:2x2x1
jax: 0.10.0
libtpu: 0.0.40
codegen_flags: <defaults>
</compile_context>

<pallas_src>
import functools

import jax
import jax.numpy as jnp
from jax.experimental import pallas as pl
from jax.experimental.pallas import tpu as pltpu

_LANE = 128  # vreg lane width == in-kernel batch lane-group width


def _round_up(x, m):
    return ((x + m - 1) // m) * m


def _tree_sum(terms):
    # Pairwise combine: same op count as a serial chain, shorter dependency
    # chain (helps v5e, which has no f32 FMA).
    terms = list(terms)
    while len(terms) > 1:
        nxt = [terms[i] + terms[i + 1] for i in range(0, len(terms) - 1, 2)]
        if len(terms) % 2:
            nxt.append(terms[-1])
        terms = nxt
    return terms[0]


def critic_kernel(x_ref, w1b_ref, b1b_ref, w2b_ref, b2_ref, o_ref):
    # x_ref  : (state_dim, TB)           batch on the lane axis, streamed per step
    # w1b_ref: (state_dim*hidden, 128)   row k*hidden+j = w1[j,k], lane-broadcast (resident)
    # b1b_ref: (hidden, 128)             b1 lane-broadcast (resident)
    # w2b_ref: (hidden, 128)             w2 lane-broadcast (resident)
    # b2_ref : (1, 1) scalar in SMEM
    # o_ref  : (1, TB) lane-dense output block
    state_dim = x_ref.shape[0]
    tb = x_ref.shape[1]
    hidden = b1b_ref.shape[0]

    # Hidden chunk (sublane) size: caps live vregs so h is never materialized.
    if hidden % 32 == 0:
        chunk = 32
    elif hidden % 16 == 0:
        chunk = 16
    elif hidden % 8 == 0:
        chunk = 8
    else:
        chunk = hidden
    n_chunks = hidden // chunk
    n_groups = tb // _LANE

    b2 = b2_ref[0, 0]

    for g in range(n_groups):                       # 128-lane batch groups
        gs = g * _LANE
        # Hoisted sublane-broadcasts of the state features for this lane group
        # (same vregs reused by every hidden chunk below).
        xb = [jnp.broadcast_to(x_ref[k:k + 1, gs:gs + _LANE], (chunk, _LANE))
              for k in range(state_dim)]
        acc = jnp.zeros((chunk, _LANE), jnp.float32)
        for c in range(n_chunks):                   # hidden sublane chunks
            cs = c * chunk
            # Layer 1: state_dim broadcast-FMAs on the VPU (MXU skipped: K=4).
            h = _tree_sum(
                w1b_ref[k * hidden + cs:k * hidden + cs + chunk, :] * xb[k]
                for k in range(state_dim))
            h = jnp.maximum(h + b1b_ref[cs:cs + chunk, :], 0.0)
            # Layer 2 (partial): weight by w2 rows, accumulate per-chunk.
            acc = acc + h * w2b_ref[cs:cs + chunk, :]
        v = jnp.sum(acc, axis=0, keepdims=True) + b2        # XLU sublane reduce
        o_ref[0:1, gs:gs + _LANE] = v.astype(o_ref.dtype)


@functools.partial(jax.jit, static_argnames=("block_batch",))
def critic_forward(states, w1, b1, w2, b2, *, block_batch=2048):
    """states: [B, state_dim] f32; w1: [hidden, state_dim]; b1: [hidden];
    w2: [1, hidden]; b2: [1]  (PyTorch nn.Linear layouts). Returns [B, 1].
    block_batch: batch tile (multiple of 128). 2048 is a good default; on
    single-TC v5e/v6e with very large rollout batches 4096-8192 is fine too."""
    B, state_dim = states.shape
    hidden = w1.shape[0]

    # Adaptive, lane-dense batch tile.
    b128 = _round_up(max(B, 1), _LANE)
    tb = min(_round_up(block_batch, _LANE), b128)
    # v7x megacore: keep >= 2 grid steps when there is enough work so both
    # TensorCores get a share (costs one extra ~0.35us step on v5e/v6e).
    if tb == b128 and b128 >= 2048:
        tb = _round_up(pl.cdiv(b128, 2), _LANE)
    grid_b = pl.cdiv(b128, tb)
    b_pad = grid_b * tb

    # Layout plumbing: batch onto the lane axis, minimal zero-pad.
    # TODO(synk): callers that can produce states in (state_dim, B) layout (or
    # share this transposed/padded x with the Actor head) should do so; this
    # small copy is the only extra HBM round trip left.
    x_t = jnp.pad(states.T, ((0, 0), (0, b_pad - B)))            # (state_dim, b_pad)

    # Pre-broadcast the resident 1-lane weight/bias columns to 128-wide lane
    # tiles once in the wrapper, so the kernel never re-broadcasts them.
    w1b = jnp.broadcast_to(w1.T[:, :, None], (state_dim, hidden, _LANE))
    w1b = w1b.reshape(state_dim * hidden, _LANE)
    b1b = jnp.broadcast_to(b1.reshape(hidden, 1), (hidden, _LANE))
    w2b = jnp.broadcast_to(w2.reshape(hidden, 1), (hidden, _LANE))
    b2c = b2.reshape(1, 1)

    weight_bytes = 4 * ((state_dim + 2) * hidden * _LANE + 1)
    cost = pl.CostEstimate(
        flops=2 * b_pad * (state_dim * hidden + hidden),
        bytes_accessed=4 * (state_dim * b_pad + b_pad) + weight_bytes,
        transcendentals=0,
    )

    out = pl.pallas_call(
        critic_kernel,
        out_shape=jax.ShapeDtypeStruct((1, b_pad), jnp.float32),
        grid=(grid_b,),
        in_specs=[
            pl.BlockSpec((state_dim, tb), lambda i: (0, i)),              # streamed
            pl.BlockSpec((state_dim * hidden, _LANE), lambda i: (0, 0)),  # resident
            pl.BlockSpec((hidden, _LANE), lambda i: (0, 0)),              # resident
            pl.BlockSpec((hidden, _LANE), lambda i: (0, 0)),              # resident
            pl.BlockSpec(memory_space=pltpu.MemorySpace.SMEM),            # b2 scalar
        ],
        out_specs=pl.BlockSpec((1, tb), lambda i: (0, i)),
        compiler_params=pltpu.CompilerParams(
            dimension_semantics=("parallel",)),
        cost_estimate=cost,
    )(x_t, w1b, b1b, w2b, b2c)

    return out[0, :B].reshape(B, 1)


def init_critic_params(key, state_dim, hidden_dim):
    # Matches PyTorch init: weight ~ N(0, 0.1), bias = 0; PyTorch layouts.
    k1, k2 = jax.random.split(key)
    w1 = 0.1 * jax.random.normal(k1, (hidden_dim, state_dim), jnp.float32)
    b1 = jnp.zeros((hidden_dim,), jnp.float32)
    w2 = 0.1 * jax.random.normal(k2, (1, hidden_dim), jnp.float32)
    b2 = jnp.zeros((1,), jnp.float32)
    return w1, b1, w2, b2


def _reference(states, w1, b1, w2, b2):
    hi = jax.lax.Precision.HIGHEST
    h = jnp.maximum(jnp.dot(states, w1.T, precision=hi) + b1, 0.0)
    return jnp.dot(h, w2.T, precision=hi) + b2


if __name__ == "__main__":
    state_dim = 4      # CartPole-v1 observation dim
    hidden_dim = 128

    key = jax.random.PRNGKey(0)
    k_params, k_states = jax.random.split(key)
    w1, b1, w2, b2 = init_critic_params(k_params, state_dim, hidden_dim)

    ok = True
    # Small PPO minibatch, a multi-lane-group batch, and a multi-grid-step batch.
    for batch in (8, 384, 2560):
        ks = jax.random.fold_in(k_states, batch)
        states = jax.random.normal(ks, (batch, state_dim), jnp.float32)
        out = jax.block_until_ready(critic_forward(states, w1, b1, w2, b2))
        ref = _reference(states, w1, b1, w2, b2)
        ok = ok and out.shape == (batch, 1)
        ok = ok and bool(jnp.allclose(out, ref, atol=1e-4, rtol=1e-5))

    assert ok
    print("KERNEL_OK")
</pallas_src>

<mosaic_0001>
module attributes {stable_mosaic.version = 11 : i64} {
  func.func @critic_kernel(%arg0: i32, %arg1: memref<4x128xf32, #tpu.memory_space<vmem>>, %arg2: memref<512x128xf32, #tpu.memory_space<vmem>>, %arg3: memref<128x128xf32, #tpu.memory_space<vmem>>, %arg4: memref<128x128xf32, #tpu.memory_space<vmem>>, %arg5: memref<1x1xf32, #tpu.memory_space<smem>>, %arg6: memref<1x128xf32, #tpu.memory_space<vmem>>) attributes {dimension_semantics = [#tpu.dimension_semantics<parallel>], iteration_bounds = array<i64: 1>, scalar_prefetch = 0 : i64, scratch_operands = 0 : i64, tpu.core_type = #tpu.core_type<tc>, window_params = [{transform_indices = @transform_0, window_bounds = array<i64: 4, 128>}, {pipeline_mode = #tpu.pipeline_mode<synchronous>, transform_indices = @transform_1, window_bounds = array<i64: 512, 128>}, {pipeline_mode = #tpu.pipeline_mode<synchronous>, transform_indices = @transform_2, window_bounds = array<i64: 128, 128>}, {pipeline_mode = #tpu.pipeline_mode<synchronous>, transform_indices = @transform_3, window_bounds = array<i64: 128, 128>}, {transform_indices = @transform_4, window_bounds = array<i64: 1, 1>}, {transform_indices = @transform_5, window_bounds = array<i64: 1, 128>}]} {
    %c0 = arith.constant 0 : index
    %c0_0 = arith.constant 0 : index
    %0 = memref.load %arg5[%c0, %c0_0] : memref<1x1xf32, #tpu.memory_space<smem>>
    %c0_1 = arith.constant 0 : index
    %c0_2 = arith.constant 0 : index
    %1 = vector.load %arg1[%c0_1, %c0_2] : memref<4x128xf32, #tpu.memory_space<vmem>>, vector<1x128xf32>
    %2 = vector.shape_cast %1 : vector<1x128xf32> to vector<1x128xf32>
    %3 = vector.broadcast %2 : vector<1x128xf32> to vector<32x128xf32>
    %c1 = arith.constant 1 : index
    %c0_3 = arith.constant 0 : index
    %4 = vector.load %arg1[%c1, %c0_3] : memref<4x128xf32, #tpu.memory_space<vmem>>, vector<1x128xf32>
    %5 = vector.shape_cast %4 : vector<1x128xf32> to vector<1x128xf32>
    %6 = vector.broadcast %5 : vector<1x128xf32> to vector<32x128xf32>
    %c2 = arith.constant 2 : index
    %c0_4 = arith.constant 0 : index
    %7 = vector.load %arg1[%c2, %c0_4] : memref<4x128xf32, #tpu.memory_space<vmem>>, vector<1x128xf32>
    %8 = vector.shape_cast %7 : vector<1x128xf32> to vector<1x128xf32>
    %9 = vector.broadcast %8 : vector<1x128xf32> to vector<32x128xf32>
    %c3 = arith.constant 3 : index
    %c0_5 = arith.constant 0 : index
    %10 = vector.load %arg1[%c3, %c0_5] : memref<4x128xf32, #tpu.memory_space<vmem>>, vector<1x128xf32>
    %11 = vector.shape_cast %10 : vector<1x128xf32> to vector<1x128xf32>
    %12 = vector.broadcast %11 : vector<1x128xf32> to vector<32x128xf32>
    %cst = arith.constant 0.000000e+00 : f32
    %13 = vector.broadcast %cst : f32 to vector<32x128xf32>
    %c0_6 = arith.constant 0 : index
    %c0_7 = arith.constant 0 : index
    %14 = vector.load %arg2[%c0_6, %c0_7] : memref<512x128xf32, #tpu.memory_space<vmem>>, vector<32x128xf32>
    %15 = arith.mulf %14, %3 : vector<32x128xf32>
    %c128 = arith.constant 128 : index
    %c0_8 = arith.constant 0 : index
    %16 = vector.load %arg2[%c128, %c0_8] : memref<512x128xf32, #tpu.memory_space<vmem>>, vector<32x128xf32>
    %17 = arith.mulf %16, %6 : vector<32x128xf32>
    %c256 = arith.constant 256 : index
    %c0_9 = arith.constant 0 : index
    %18 = vector.load %arg2[%c256, %c0_9] : memref<512x128xf32, #tpu.memory_space<vmem>>, vector<32x128xf32>
    %19 = arith.mulf %18, %9 : vector<32x128xf32>
    %c384 = arith.constant 384 : index
    %c0_10 = arith.constant 0 : index
    %20 = vector.load %arg2[%c384, %c0_10] : memref<512x128xf32, #tpu.memory_space<vmem>>, vector<32x128xf32>
    %21 = arith.mulf %20, %12 : vector<32x128xf32>
    %22 = arith.addf %15, %17 : vector<32x128xf32>
    %23 = arith.addf %19, %21 : vector<32x128xf32>
    %24 = arith.addf %22, %23 : vector<32x128xf32>
    %c0_11 = arith.constant 0 : index
    %c0_12 = arith.constant 0 : index
    %25 = vector.load %arg3[%c0_11, %c0_12] : memref<128x128xf32, #tpu.memory_space<vmem>>, vector<32x128xf32>
    %26 = arith.addf %24, %25 : vector<32x128xf32>
    %cst_13 = arith.constant 0.000000e+00 : f32
    %27 = vector.broadcast %cst_13 : f32 to vector<32x128xf32>
    %28 = arith.maximumf %26, %27 : vector<32x128xf32>
    %c0_14 = arith.constant 0 : index
    %c0_15 = arith.constant 0 : index
    %29 = vector.load %arg4[%c0_14, %c0_15] : memref<128x128xf32, #tpu.memory_space<vmem>>, vector<32x128xf32>
    %30 = arith.mulf %28, %29 : vector<32x128xf32>
    %31 = arith.addf %13, %30 : vector<32x128xf32>
    %c32 = arith.constant 32 : index
    %c0_16 = arith.constant 0 : index
    %32 = vector.load %arg2[%c32, %c0_16] : memref<512x128xf32, #tpu.memory_space<vmem>>, vector<32x128xf32>
    %33 = arith.mulf %32, %3 : vector<32x128xf32>
    %c160 = arith.constant 160 : index
    %c0_17 = arith.constant 0 : index
    %34 = vector.load %arg2[%c160, %c0_17] : memref<512x128xf32, #tpu.memory_space<vmem>>, vector<32x128xf32>
    %35 = arith.mulf %34, %6 : vector<32x128xf32>
    %c288 = arith.constant 288 : index
    %c0_18 = arith.constant 0 : index
    %36 = vector.load %arg2[%c288, %c0_18] : memref<512x128xf32, #tpu.memory_space<vmem>>, vector<32x128xf32>
    %37 = arith.mulf %36, %9 : vector<32x128xf32>
    %c416 = arith.constant 416 : index
    %c0_19 = arith.constant 0 : index
    %38 = vector.load %arg2[%c416, %c0_19] : memref<512x128xf32, #tpu.memory_space<vmem>>, vector<32x128xf32>
    %39 = arith.mulf %38, %12 : vector<32x128xf32>
    %40 = arith.addf %33, %35 : vector<32x128xf32>
    %41 = arith.addf %37, %39 : vector<32x128xf32>
    %42 = arith.addf %40, %41 : vector<32x128xf32>
    %c32_20 = arith.constant 32 : index
    %c0_21 = arith.constant 0 : index
    %43 = vector.load %arg3[%c32_20, %c0_21] : memref<128x128xf32, #tpu.memory_space<vmem>>, vector<32x128xf32>
    %44 = arith.addf %42, %43 : vector<32x128xf32>
    %cst_22 = arith.constant 0.000000e+00 : f32
    %45 = vector.broadcast %cst_22 : f32 to vector<32x128xf32>
    %46 = arith.maximumf %44, %45 : vector<32x128xf32>
    %c32_23 = arith.constant 32 : index
    %c0_24 = arith.constant 0 : index
    %47 = vector.load %arg4[%c32_23, %c0_24] : memref<128x128xf32, #tpu.memory_space<vmem>>, vector<32x128xf32>
    %48 = arith.mulf %46, %47 : vector<32x128xf32>
    %49 = arith.addf %31, %48 : vector<32x128xf32>
    %c64 = arith.constant 64 : index
    %c0_25 = arith.constant 0 : index
    %50 = vector.load %arg2[%c64, %c0_25] : memref<512x128xf32, #tpu.memory_space<vmem>>, vector<32x128xf32>
    %51 = arith.mulf %50, %3 : vector<32x128xf32>
    %c192 = arith.constant 192 : index
    %c0_26 = arith.constant 0 : index
    %52 = vector.load %arg2[%c192, %c0_26] : memref<512x128xf32, #tpu.memory_space<vmem>>, vector<32x128xf32>
    %53 = arith.mulf %52, %6 : vector<32x128xf32>
    %c320 = arith.constant 320 : index
    %c0_27 = arith.constant 0 : index
    %54 = vector.load %arg2[%c320, %c0_27] : memref<512x128xf32, #tpu.memory_space<vmem>>, vector<32x128xf32>
    %55 = arith.mulf %54, %9 : vector<32x128xf32>
    %c448 = arith.constant 448 : index
    %c0_28 = arith.constant 0 : index
    %56 = vector.load %arg2[%c448, %c0_28] : memref<512x128xf32, #tpu.memory_space<vmem>>, vector<32x128xf32>
    %57 = arith.mulf %56, %12 : vector<32x128xf32>
    %58 = arith.addf %51, %53 : vector<32x128xf32>
    %59 = arith.addf %55, %57 : vector<32x128xf32>
    %60 = arith.addf %58, %59 : vector<32x128xf32>
    %c64_29 = arith.constant 64 : index
    %c0_30 = arith.constant 0 : index
    %61 = vector.load %arg3[%c64_29, %c0_30] : memref<128x128xf32, #tpu.memory_space<vmem>>, vector<32x128xf32>
    %62 = arith.addf %60, %61 : vector<32x128xf32>
    %cst_31 = arith.constant 0.000000e+00 : f32
    %63 = vector.broadcast %cst_31 : f32 to vector<32x128xf32>
    %64 = arith.maximumf %62, %63 : vector<32x128xf32>
    %c64_32 = arith.constant 64 : index
    %c0_33 = arith.constant 0 : index
    %65 = vector.load %arg4[%c64_32, %c0_33] : memref<128x128xf32, #tpu.memory_space<vmem>>, vector<32x128xf32>
    %66 = arith.mulf %64, %65 : vector<32x128xf32>
    %67 = arith.addf %49, %66 : vector<32x128xf32>
    %c96 = arith.constant 96 : index
    %c0_34 = arith.constant 0 : index
    %68 = vector.load %arg2[%c96, %c0_34] : memref<512x128xf32, #tpu.memory_space<vmem>>, vector<32x128xf32>
    %69 = arith.mulf %68, %3 : vector<32x128xf32>
    %c224 = arith.constant 224 : index
    %c0_35 = arith.constant 0 : index
    %70 = vector.load %arg2[%c224, %c0_35] : memref<512x128xf32, #tpu.memory_space<vmem>>, vector<32x128xf32>
    %71 = arith.mulf %70, %6 : vector<32x128xf32>
    %c352 = arith.constant 352 : index
    %c0_36 = arith.constant 0 : index
    %72 = vector.load %arg2[%c352, %c0_36] : memref<512x128xf32, #tpu.memory_space<vmem>>, vector<32x128xf32>
    %73 = arith.mulf %72, %9 : vector<32x128xf32>
    %c480 = arith.constant 480 : index
    %c0_37 = arith.constant 0 : index
    %74 = vector.load %arg2[%c480, %c0_37] : memref<512x128xf32, #tpu.memory_space<vmem>>, vector<32x128xf32>
    %75 = arith.mulf %74, %12 : vector<32x128xf32>
    %76 = arith.addf %69, %71 : vector<32x128xf32>
    %77 = arith.addf %73, %75 : vector<32x128xf32>
    %78 = arith.addf %76, %77 : vector<32x128xf32>
    %c96_38 = arith.constant 96 : index
    %c0_39 = arith.constant 0 : index
    %79 = vector.load %arg3[%c96_38, %c0_39] : memref<128x128xf32, #tpu.memory_space<vmem>>, vector<32x128xf32>
    %80 = arith.addf %78, %79 : vector<32x128xf32>
    %cst_40 = arith.constant 0.000000e+00 : f32
    %81 = vector.broadcast %cst_40 : f32 to vector<32x128xf32>
    %82 = arith.maximumf %80, %81 : vector<32x128xf32>
    %c96_41 = arith.constant 96 : index
    %c0_42 = arith.constant 0 : index
    %83 = vector.load %arg4[%c96_41, %c0_42] : memref<128x128xf32, #tpu.memory_space<vmem>>, vector<32x128xf32>
    %84 = arith.mulf %82, %83 : vector<32x128xf32>
    %85 = arith.addf %67, %84 : vector<32x128xf32>
    %cst_43 = arith.constant dense<0.000000e+00> : vector<128xf32>
    %86 = vector.multi_reduction <add>, %85, %cst_43 [0] : vector<32x128xf32> to vector<128xf32>
    %87 = vector.shape_cast %86 : vector<128xf32> to vector<1x128xf32>
    %88 = vector.broadcast %0 : f32 to vector<1x128xf32>
    %89 = arith.addf %87, %88 : vector<1x128xf32>
    %c0_44 = arith.constant 0 : index
    %c0_45 = arith.constant 0 : index
    %90 = vector.load %arg6[%c0_44, %c0_45] : memref<1x128xf32, #tpu.memory_space<vmem>>, vector<1x128xf32>
    tpu.vector_store %arg6[%c0_44, %c0_45], %89 {strides = array<i32>} : memref<1x128xf32, #tpu.memory_space<vmem>>, vector<1x128xf32>,
    return
  }
  func.func @transform_0(%arg0: i32) -> (i32, i32) {
    %c0_i32 = arith.constant 0 : i32
    %c0_i32_0 = arith.constant 0 : i32
    return %c0_i32, %arg0 : i32, i32
  }
  func.func @transform_1(%arg0: i32) -> (i32, i32) {
    %c0_i32 = arith.constant 0 : i32
    %c0_i32_0 = arith.constant 0 : i32
    %c0_i32_1 = arith.constant 0 : i32
    return %c0_i32, %c0_i32_0 : i32, i32
  }
  func.func @transform_2(%arg0: i32) -> (i32, i32) {
    %c0_i32 = arith.constant 0 : i32
    %c0_i32_0 = arith.constant 0 : i32
    %c0_i32_1 = arith.constant 0 : i32
    return %c0_i32, %c0_i32_0 : i32, i32
  }
  func.func @transform_3(%arg0: i32) -> (i32, i32) {
    %c0_i32 = arith.constant 0 : i32
    %c0_i32_0 = arith.constant 0 : i32
    %c0_i32_1 = arith.constant 0 : i32
    return %c0_i32, %c0_i32_0 : i32, i32
  }
  func.func @transform_4(%arg0: i32) -> (i32, i32) {
    %c0_i32 = arith.constant 0 : i32
    %c0_i32_0 = arith.constant 0 : i32
    %c0_i32_1 = arith.constant 0 : i32
    return %c0_i32, %c0_i32_0 : i32, i32
  }
  func.func @transform_5(%arg0: i32) -> (i32, i32) {
    %c0_i32 = arith.constant 0 : i32
    %c0_i32_0 = arith.constant 0 : i32
    return %c0_i32, %arg0 : i32, i32
  }
}

</mosaic_0001>

<bundles_post_ra>
// kernel: critic_forward.1
= control target key start
LH: loop header
LB: loop body
LE: loop exit
PB: predicated region body
PF: predicated region fallthrough
CT: control target
= control target key end

     0   :  { %s772_s0 = inlined_call_operand.vmem [shape: f32[4,128], index: 0, kind: input, shape index: {}]   ;;  %s773_s1 = inlined_call_operand.vmem [shape: f32[512,128], index: 1, kind: input, shape index: {}]   ;;  %s774_s2 = inlined_call_operand.vmem [shape: f32[128,128], index: 2, kind: input, shape index: {}]   ;;  %s775_s3 = inlined_call_operand.vmem [shape: f32[128,128], index: 3, kind: input, shape index: {}]   ;;  %s776_s4 = inlined_call_operand.<no memory space> [shape: f32[1,1], index: 4, kind: input, shape index: {}]   ;;  %s777_s5 = inlined_call_operand.vmem [shape: f32[1,128], index: 5, kind: output, shape index: {}]  }
   0x1   :  { %v367_v0 = vld [vmem:[%s772_s0] ss:$0 sm:$0xff]  ;;  %v372_v1 = vld [vmem:[%s772_s0 + $0x1] ss:$0 sm:$0xff]  ;;  %v377_v2 = vld [vmem:[%s772_s0 + $0x2] ss:$0 sm:$0xff] }
   0x2   :  { %v382_v3 = vld [vmem:[%s772_s0 + $0x3] ss:$0 sm:$0xff]  ;;  %v43_v5 = vld [vmem:[%s773_s1 + $0x8] sm:$0xff]  ;;  %v44_v6 = vld [vmem:[%s773_s1 + $0x10] sm:$0xff] }
   0x3   :  { %v42_v4 = vld [vmem:[%s773_s1] sm:$0xff]  ;;  %v45_v7 = vld [vmem:[%s773_s1 + $0x18] sm:$0xff]  ;;  %v47_v10 = vmul.f32 %v367_v0, %v43_v5  ;;  %v48_v11 = vmul.f32 %v367_v0, %v44_v6  ;;  %v51_v12 = vld [vmem:[%s773_s1 + $0x88] sm:$0xff] }
   0x4   :  { %v50_v8 = vld [vmem:[%s773_s1 + $0x80] sm:$0xff]  ;;  %v46_v9 = vmul.f32 %v367_v0, %v42_v4  ;;  %v52_v13 = vld [vmem:[%s773_s1 + $0x90] sm:$0xff]  ;;  %v53_v14 = vld [vmem:[%s773_s1 + $0x98] sm:$0xff]  ;;  %v49_v15 = vmul.f32 %v367_v0, %v45_v7  ;;  %v55_v17 = vmul.f32 %v372_v1, %v51_v12 }
   0x5   :  { %v54_v16 = vmul.f32 %v372_v1, %v50_v8  ;;  %v56_v18 = vmul.f32 %v372_v1, %v52_v13  ;;  %v58_v19 = vld [vmem:[%s773_s1 + $0x100] sm:$0xff]  ;;  %v59_v20 = vld [vmem:[%s773_s1 + $0x108] sm:$0xff]  ;;  %v60_v21 = vld [vmem:[%s773_s1 + $0x110] sm:$0xff]  ;;  %v57_v22 = vmul.f32 %v372_v1, %v53_v14 }
   0x6   :  { %v61_v23 = vld [vmem:[%s773_s1 + $0x118] sm:$0xff]  ;;  %v62_v24 = vmul.f32 %v377_v2, %v58_v19  ;;  %v63_v25 = vmul.f32 %v377_v2, %v59_v20  ;;  %v64_v26 = vmul.f32 %v377_v2, %v60_v21  ;;  %v66_v27 = vld [vmem:[%s773_s1 + $0x180] sm:$0xff]  ;;  %v67_v28 = vld [vmem:[%s773_s1 + $0x188] sm:$0xff]  ;;  %v75_v37 = vadd.f32 %v55_v17, %v47_v10 }
   0x7   :  { %v65_v29 = vmul.f32 %v377_v2, %v61_v23  ;;  %v68_v30 = vld [vmem:[%s773_s1 + $0x190] sm:$0xff]  ;;  %v69_v31 = vld [vmem:[%s773_s1 + $0x198] sm:$0xff]  ;;  %v70_v32 = vmul.f32 %v382_v3, %v66_v27  ;;  %v71_v33 = vmul.f32 %v382_v3, %v67_v28  ;;  %v74_v36 = vadd.f32 %v54_v16, %v46_v9  ;;  %v110_v44 = vld [vmem:[%s773_s1 + $0x20] sm:$0xff] }
   0x8   :  { %v72_v34 = vmul.f32 %v382_v3, %v68_v30  ;;  %v73_v35 = vmul.f32 %v382_v3, %v69_v31  ;;  %v76_v40 = vadd.f32 %v56_v18, %v48_v11  ;;  %v77_v41 = vadd.f32 %v57_v22, %v49_v15  ;;  %v111_v45 = vld [vmem:[%s773_s1 + $0x28] sm:$0xff]  ;;  %v112_v46 = vld [vmem:[%s773_s1 + $0x30] sm:$0xff]  ;;  %v113_v47 = vld [vmem:[%s773_s1 + $0x38] sm:$0xff] }
   0x9   :  { %v78_v38 = vadd.f32 %v70_v32, %v62_v24  ;;  %v79_v39 = vadd.f32 %v71_v33, %v63_v25  ;;  %v118_v48 = vld [vmem:[%s773_s1 + $0xa0] sm:$0xff]  ;;  %v87_v50 = vld [vmem:[%s774_s2 + $0x8] sm:$0xff]  ;;  %v120_v52 = vld [vmem:[%s773_s1 + $0xb0] sm:$0xff]  ;;  %v114_v57 = vmul.f32 %v367_v0, %v110_v44  ;;  %v115_v58 = vmul.f32 %v367_v0, %v111_v45 }
   0xa   :  { %v80_v42 = vadd.f32 %v72_v34, %v64_v26  ;;  %v81_v43 = vadd.f32 %v73_v35, %v65_v29  ;;  %v86_v49 = vld [vmem:[%s774_s2] sm:$0xff]  ;;  %v119_v51 = vld [vmem:[%s773_s1 + $0xa8] sm:$0xff]  ;;  %v121_v53 = vld [vmem:[%s773_s1 + $0xb8] sm:$0xff]  ;;  %v116_v4 = vmul.f32 %v367_v0, %v112_v46  ;;  %v117_v5 = vmul.f32 %v367_v0, %v113_v47 }
   0xb   :  { %v82_v54 = vadd.f32 %v78_v38, %v74_v36  ;;  %v83_v55 = vadd.f32 %v79_v39, %v75_v37  ;;  %v88_v56 = vld [vmem:[%s774_s2 + $0x10] sm:$0xff]  ;;  %v126_v59 = vld [vmem:[%s773_s1 + $0x120] sm:$0xff]  ;;  %v127_v60 = vld [vmem:[%s773_s1 + $0x128] sm:$0xff]  ;;  %v122_v10 = vmul.f32 %v372_v1, %v118_v48  ;;  %v123_v11 = vmul.f32 %v372_v1, %v119_v51 }
   0xc   :  { %v128_v61 = vld [vmem:[%s773_s1 + $0x130] sm:$0xff]  ;;  %v84_v62 = vadd.f32 %v80_v42, %v76_v40  ;;  %v85_v63 = vadd.f32 %v81_v43, %v77_v41  ;;  %v129_v6 = vld [vmem:[%s773_s1 + $0x138] sm:$0xff]  ;;  %v134_v7 = vld [vmem:[%s773_s1 + $0x1a0] sm:$0xff]  ;;  %v124_v12 = vmul.f32 %v372_v1, %v120_v52  ;;  %v125_v13 = vmul.f32 %v372_v1, %v121_v53 }
   0xd   :  { %v135_v8 = vld [vmem:[%s773_s1 + $0x1a8] sm:$0xff]  ;;  %v89_v9 = vld [vmem:[%s774_s2 + $0x18] sm:$0xff]  ;;  %v136_v14 = vld [vmem:[%s773_s1 + $0x1b0] sm:$0xff]  ;;  %v130_v16 = vmul.f32 %v377_v2, %v126_v59  ;;  %v131_v17 = vmul.f32 %v377_v2, %v127_v60  ;;  %v132_v18 = vmul.f32 %v377_v2, %v128_v61  ;;  %v133_v19 = vmul.f32 %v377_v2, %v129_v6 }
   0xe   :  { %v137_v15 = vld [vmem:[%s773_s1 + $0x1b8] sm:$0xff]  ;;  %v520_v20 = vadd.f32 %v86_v49, %v82_v54  ;;  %v522_v21 = vadd.f32 %v87_v50, %v83_v55  ;;  %v138_v22 = vmul.f32 %v382_v3, %v134_v7  ;;  %v139_v23 = vmul.f32 %v382_v3, %v135_v8  ;;  %v154_v32 = vld [vmem:[%s774_s2 + $0x20] sm:$0xff]  ;;  %v155_v33 = vld [vmem:[%s774_s2 + $0x28] sm:$0xff] }
   0xf   :  { %v526_v24 = vadd.f32 %v88_v56, %v84_v62  ;;  %v528_v25 = vadd.f32 %v89_v9, %v85_v63  ;;  %v140_v26 = vmul.f32 %v382_v3, %v136_v14  ;;  %v141_v27 = vmul.f32 %v382_v3, %v137_v15  ;;  %v178_v34 = vld [vmem:[%s773_s1 + $0x40] sm:$0xff]  ;;  %v179_v39 = vld [vmem:[%s773_s1 + $0x48] sm:$0xff]  ;;  %v180_v40 = vld [vmem:[%s773_s1 + $0x50] sm:$0xff] }
  0x10   :  { %v142_v28 = vadd.f32 %v122_v10, %v114_v57  ;;  %v143_v29 = vadd.f32 %v123_v11, %v115_v58  ;;  %v144_v30 = vadd.f32 %v124_v12, %v116_v4  ;;  %v145_v31 = vadd.f32 %v125_v13, %v117_v5  ;;  %v181_v41 = vld [vmem:[%s773_s1 + $0x58] sm:$0xff]  ;;  %v186_v44 = vld [vmem:[%s773_s1 + $0xc0] sm:$0xff]  ;;  %v187_v45 = vld [vmem:[%s773_s1 + $0xc8] sm:$0xff] }
  0x11   :  { %v146_v35 = vadd.f32 %v138_v22, %v130_v16  ;;  %v147_v36 = vadd.f32 %v139_v23, %v131_v17  ;;  %v148_v37 = vadd.f32 %v140_v26, %v132_v18  ;;  %v149_v38 = vadd.f32 %v141_v27, %v133_v19  ;;  %v188_v46 = vld [vmem:[%s773_s1 + $0xd0] sm:$0xff]  ;;  %v189_v51 = vld [vmem:[%s773_s1 + $0xd8] sm:$0xff]  ;;  %v194_v52 = vld [vmem:[%s773_s1 + $0x140] sm:$0xff] }
  0x12   :  { %v94_v42 = vmax.f32 %v520_v20, 0.0  ;;  %v95_v43 = vmax.f32 %v522_v21, 0.0  ;;  %v96_v47 = vmax.f32 %v526_v24, 0.0  ;;  %v97_v48 = vmax.f32 %v528_v25, 0.0  ;;  %v195_v53 = vld [vmem:[%s773_s1 + $0x148] sm:$0xff]  ;;  %v196_v58 = vld [vmem:[%s773_s1 + $0x150] sm:$0xff] }
  0x13   :  { %v150_v49 = vadd.f32 %v146_v35, %v142_v28  ;;  %v151_v50 = vadd.f32 %v147_v36, %v143_v29  ;;  %v182_v54 = vmul.f32 %v367_v0, %v178_v34  ;;  %v183_v55 = vmul.f32 %v367_v0, %v179_v39  ;;  %v197_v59 = vld [vmem:[%s773_s1 + $0x158] sm:$0xff]  ;;  %v202_v60 = vld [vmem:[%s773_s1 + $0x1c0] sm:$0xff]  ;;  %v203_v5 = vld [vmem:[%s773_s1 + $0x1c8] sm:$0xff] }
  0x14   :  { %v184_v56 = vmul.f32 %v367_v0, %v180_v40  ;;  %v185_v57 = vmul.f32 %v367_v0, %v181_v41  ;;  %v152_v61 = vadd.f32 %v148_v37, %v144_v30  ;;  %v153_v62 = vadd.f32 %v149_v38, %v145_v31  ;;  %v204_v6 = vld [vmem:[%s773_s1 + $0x1d0] sm:$0xff]  ;;  %v205_v7 = vld [vmem:[%s773_s1 + $0x1d8] sm:$0xff]  ;;  %v98_v14 = vld [vmem:[%s775_s3] sm:$0xff] }
  0x15   :  { %v158_v63 = vadd.f32 %v154_v32, %v150_v49  ;;  %v159_v4 = vadd.f32 %v155_v33, %v151_v50  ;;  %v156_v8 = vld [vmem:[%s774_s2 + $0x30] sm:$0xff]  ;;  %v157_v9 = vld [vmem:[%s774_s2 + $0x38] sm:$0xff]  ;;  %v190_v10 = vmul.f32 %v372_v1, %v186_v44  ;;  %v191_v11 = vmul.f32 %v372_v1, %v187_v45  ;;  %v99_v19 = vld [vmem:[%s775_s3 + $0x8] sm:$0xff] }
  0x16   :  { %v192_v12 = vmul.f32 %v372_v1, %v188_v46  ;;  %v193_v13 = vmul.f32 %v372_v1, %v189_v51  ;;  %v198_v15 = vmul.f32 %v377_v2, %v194_v52  ;;  %v199_v16 = vmul.f32 %v377_v2, %v195_v53  ;;  %v100_v20 = vld [vmem:[%s775_s3 + $0x10] sm:$0xff]  ;;  %v101_v21 = vld [vmem:[%s775_s3 + $0x18] sm:$0xff]  ;;  %v166_v30 = vld [vmem:[%s775_s3 + $0x20] sm:$0xff] }
  0x17   :  { %v200_v17 = vmul.f32 %v377_v2, %v196_v58  ;;  %v201_v18 = vmul.f32 %v377_v2, %v197_v59  ;;  %v206_v22 = vmul.f32 %v382_v3, %v202_v60  ;;  %v207_v23 = vmul.f32 %v382_v3, %v203_v5  ;;  %v167_v31 = vld [vmem:[%s775_s3 + $0x28] sm:$0xff]  ;;  %v222_v40 = vld [vmem:[%s774_s2 + $0x40] sm:$0xff]  ;;  %v224_v44 = vld [vmem:[%s774_s2 + $0x50] sm:$0xff] }
  0x18   :  { %v208_v24 = vmul.f32 %v382_v3, %v204_v6  ;;  %v209_v25 = vmul.f32 %v382_v3, %v205_v7  ;;  %v624_v26 = vadd.f32 %v156_v8, %v152_v61  ;;  %v626_v27 = vadd.f32 %v157_v9, %v153_v62  ;;  %v223_v41 = vld [vmem:[%s774_s2 + $0x48] sm:$0xff]  ;;  %v248_v50 = vld [vmem:[%s773_s1 + $0x70] sm:$0xff]  ;;  %v249_v51 = vld [vmem:[%s773_s1 + $0x78] sm:$0xff] }
  0x19   :  { %v162_v28 = vmax.f32 %v158_v63, 0.0  ;;  %v163_v29 = vmax.f32 %v159_v4, 0.0  ;;  %v210_v32 = vadd.f32 %v190_v10, %v182_v54  ;;  %v211_v33 = vadd.f32 %v191_v11, %v183_v55  ;;  %v247_v49 = vld [vmem:[%s773_s1 + $0x68] sm:$0xff]  ;;  %v256_v58 = vld [vmem:[%s773_s1 + $0xf0] sm:$0xff]  ;;  %v257_v63 = vld [vmem:[%s773_s1 + $0xf8] sm:$0xff] }
  0x1a   :  { %v212_v34 = vadd.f32 %v192_v12, %v184_v56  ;;  %v213_v35 = vadd.f32 %v193_v13, %v185_v57  ;;  %v634_v36 = vmul.f32 %v98_v14, %v94_v42  ;;  %v636_v37 = vmul.f32 %v99_v19, %v95_v43  ;;  %v246_v42 = vld [vmem:[%s773_s1 + $0x60] sm:$0xff]  ;;  %v255_v57 = vld [vmem:[%s773_s1 + $0xe8] sm:$0xff]  ;;  %v264_v10 = vld [vmem:[%s773_s1 + $0x170] sm:$0xff] }
  0x1b   :  { %v638_v38 = vmul.f32 %v100_v20, %v96_v47  ;;  %v640_v39 = vmul.f32 %v101_v21, %v97_v48  ;;  %v214_v43 = vadd.f32 %v206_v22, %v198_v15  ;;  %v215_v45 = vadd.f32 %v207_v23, %v199_v16  ;;  %v225_v48 = vld [vmem:[%s774_s2 + $0x58] sm:$0xff]  ;;  %v254_v56 = vld [vmem:[%s773_s1 + $0xe0] sm:$0xff]  ;;  %v263_v5 = vld [vmem:[%s773_s1 + $0x168] sm:$0xff] }
  0x1c   :  { %v216_v46 = vadd.f32 %v208_v24, %v200_v17  ;;  %v217_v47 = vadd.f32 %v209_v25, %v201_v18  ;;  %v164_v52 = vmax.f32 %v624_v26, 0.0  ;;  %v165_v53 = vmax.f32 %v626_v27, 0.0  ;;  %v262_v4 = vld [vmem:[%s773_s1 + $0x160] sm:$0xff]  ;;  %v265_v11 = vld [vmem:[%s773_s1 + $0x178] sm:$0xff]  ;;  %v272_v17 = vld [vmem:[%s773_s1 + $0x1f0] sm:$0xff] }
  0x1d   :  { %v170_v54 = vmul.f32 %v166_v30, %v162_v28  ;;  %v171_v55 = vmul.f32 %v167_v31, %v163_v29  ;;  %v218_v59 = vadd.f32 %v214_v43, %v210_v32  ;;  %v219_v60 = vadd.f32 %v215_v45, %v211_v33  ;;  %v270_v12 = vld [vmem:[%s773_s1 + $0x1e0] sm:$0xff]  ;;  %v273_v18 = vld [vmem:[%s773_s1 + $0x1f8] sm:$0xff]  ;;  %v168_v19 = vld [vmem:[%s775_s3 + $0x30] sm:$0xff] }
  0x1e   :  { %v220_v61 = vadd.f32 %v216_v46, %v212_v34  ;;  %v221_v62 = vadd.f32 %v217_v47, %v213_v35  ;;  %v250_v6 = vmul.f32 %v367_v0, %v246_v42  ;;  %v251_v7 = vmul.f32 %v367_v0, %v247_v49  ;;  %v169_v28 = vld [vmem:[%s775_s3 + $0x38] sm:$0xff] }
  0x1f   :  { %v252_v8 = vmul.f32 %v367_v0, %v248_v50  ;;  %v253_v9 = vmul.f32 %v367_v0, %v249_v51  ;;  %v226_v13 = vadd.f32 %v222_v40, %v218_v59  ;;  %v227_v14 = vadd.f32 %v223_v41, %v219_v60  ;;  %v271_v0 = vld [vmem:[%s773_s1 + $0x1e8] sm:$0xff]  ;;  %v236_v41 = vld [vmem:[%s775_s3 + $0x50] sm:$0xff]  ;;  %v237_v49 = vld [vmem:[%s775_s3 + $0x58] sm:$0xff] }
  0x20   :  { %v228_v15 = vadd.f32 %v224_v44, %v220_v61  ;;  %v258_v16 = vmul.f32 %v372_v1, %v254_v56  ;;  %v229_v20 = vadd.f32 %v225_v48, %v221_v62  ;;  %v259_v21 = vmul.f32 %v372_v1, %v255_v57  ;;  %v235_v40 = vld [vmem:[%s775_s3 + $0x48] sm:$0xff]  ;;  %v290_v57 = vld [vmem:[%s774_s2 + $0x60] sm:$0xff] }
  0x21   :  { %v260_v22 = vmul.f32 %v372_v1, %v256_v58  ;;  %v261_v23 = vmul.f32 %v372_v1, %v257_v63  ;;  %v266_v24 = vmul.f32 %v377_v2, %v262_v4  ;;  %v267_v25 = vmul.f32 %v377_v2, %v263_v5 }
  0x22   :  { %v268_v26 = vmul.f32 %v377_v2, %v264_v10  ;;  %v269_v27 = vmul.f32 %v377_v2, %v265_v11  ;;  %v274_v29 = vmul.f32 %v382_v3, %v270_v12  ;;  %v275_v30 = vmul.f32 %v382_v3, %v271_v0  ;;  %v234_v2 = vld [vmem:[%s775_s3 + $0x40] sm:$0xff] }
  0x23   :  { %v276_v31 = vmul.f32 %v382_v3, %v272_v17  ;;  %v277_v1 = vmul.f32 %v382_v3, %v273_v18  ;;  %v172_v32 = vmul.f32 %v168_v19, %v164_v52  ;;  %v230_v33 = vmax.f32 %v226_v13, 0.0  ;;  %v303_v13 = vld [vmem:[%s775_s3 + $0x68] sm:$0xff] }
  0x24   :  { %v231_v34 = vmax.f32 %v227_v14, 0.0  ;;  %v232_v35 = vmax.f32 %v228_v15, 0.0  ;;  %v278_v44 = vadd.f32 %v258_v16, %v250_v6  ;;  %v279_v42 = vadd.f32 %v259_v21, %v251_v7  ;;  %v305_v14 = vld [vmem:[%s775_s3 + $0x78] sm:$0xff] }
  0x25   :  { %v280_v43 = vadd.f32 %v260_v22, %v252_v8  ;;  %v281_v3 = vadd.f32 %v261_v23, %v253_v9  ;;  %v173_v45 = vmul.f32 %v169_v28, %v165_v53  ;;  %v174_v46 = vadd.f32 %v170_v54, %v634_v36  ;;  %v292_v54 = vld [vmem:[%s774_s2 + $0x70] sm:$0xff]  ;;  %v302_v9 = vld [vmem:[%s775_s3 + $0x60] sm:$0xff] }
  0x26   :  { %v175_v47 = vadd.f32 %v171_v55, %v636_v37  ;;  %v233_v48 = vmax.f32 %v229_v20, 0.0  ;;  %v282_v50 = vadd.f32 %v274_v29, %v266_v24  ;;  %v283_v51 = vadd.f32 %v275_v30, %v267_v25  ;;  %v291_v37 = vld [vmem:[%s774_s2 + $0x68] sm:$0xff]  ;;  %v293_v55 = vld [vmem:[%s774_s2 + $0x78] sm:$0xff] }
  0x27   :  { %v284_v52 = vadd.f32 %v276_v31, %v268_v26  ;;  %v285_v56 = vadd.f32 %v277_v1, %v269_v27  ;;  %v176_v58 = vadd.f32 %v172_v32, %v638_v38  ;;  %v238_v53 = vmul.f32 %v234_v2, %v230_v33 }
  0x28   :  { %v239_v59 = vmul.f32 %v235_v40, %v231_v34  ;;  %v240_v36 = vmul.f32 %v236_v41, %v232_v35  ;;  %v286_v60 = vadd.f32 %v282_v50, %v278_v44  ;;  %v287_v61 = vadd.f32 %v283_v51, %v279_v42 }
  0x29   :  { %v288_v62 = vadd.f32 %v284_v52, %v280_v43  ;;  %v289_v63 = vadd.f32 %v285_v56, %v281_v3  ;;  %v177_v38 = vadd.f32 %v173_v45, %v640_v39  ;;  %v241_v4 = vmul.f32 %v237_v49, %v233_v48  ;;  %v304_v39 = vld [vmem:[%s775_s3 + $0x70] sm:$0xff] }
  0x2a   :  { %v294_v5 = vadd.f32 %v290_v57, %v286_v60  ;;  %v295_v6 = vadd.f32 %v291_v37, %v287_v61  ;;  %v242_v10 = vadd.f32 %v238_v53, %v174_v46  ;;  %v243_v11 = vadd.f32 %v239_v59, %v175_v47 }
  0x2b   :  { %v296_v7 = vadd.f32 %v292_v54, %v288_v62  ;;  %v297_v8 = vadd.f32 %v293_v55, %v289_v63  ;;  %v244_v12 = vadd.f32 %v240_v36, %v176_v58  ;;  %v245_v18 = vadd.f32 %v241_v4, %v177_v38 }
  0x2c   :  { %v298_v15 = vmax.f32 %v294_v5, 0.0  ;;  %v299_v16 = vmax.f32 %v295_v6, 0.0  ;;  %v323_v34 = vstv %s776_s4 }
  0x2d   :  { %v300_v0 = vmax.f32 %v296_v7, 0.0  ;;  %v301_v17 = vmax.f32 %v297_v8, 0.0 }
  0x2e   :  { %v306_v19 = vmul.f32 %v302_v9, %v298_v15  ;;  %v307_v20 = vmul.f32 %v303_v13, %v299_v16 }
  0x2f   :  { %v308_v21 = vmul.f32 %v304_v39, %v300_v0  ;;  %v309_v22 = vmul.f32 %v305_v14, %v301_v17 }
  0x30   :  { %v310_v23 = vadd.f32 %v306_v19, %v242_v10  ;;  %v311_v24 = vadd.f32 %v307_v20, %v243_v11 }
  0x31   :  { %v312_v25 = vadd.f32 %v308_v21, %v244_v12  ;;  %v313_v26 = vadd.f32 %v309_v22, %v245_v18 }
  0x32   :  { %v314_v27 = vadd.f32 %v311_v24, %v310_v23 }
  0x34   :  { %v315_v28 = vadd.f32 %v314_v27, %v312_v25 }
  0x36   :  { %v316_v29 = vadd.f32 %v315_v28, %v313_v26 }
  0x38   :  { %v317_v30 = vrot.slane %v316_v29, 4 }
  0x3a   :  { %v318_v31 = vadd.f32 %v317_v30, %v316_v29 }
  0x3c   :  { %v319_v1 = vrot.slane %v318_v31, 2 }
  0x3e   :  { %v320_v32 = vadd.f32 %v319_v1, %v318_v31 }
  0x40   :  { %v321_v33 = vrot.slane %v320_v32, 1 }
  0x42   :  { %v322_v35 = vadd.f32 %v321_v33, %v320_v32 }
  0x44   :  { %v324_v2 = vadd.f32 %v323_v34, %v322_v35 }
  0x46   :  { %325 = vst [vmem:[%s777_s5] sm:$0x1] %v324_v2 }

</bundles_post_ra>
